<compile_context>
chip_gen: v5e
topology: v5e:2x2
jax: 0.10.0
libtpu: 0.0.40
codegen_flags: <defaults>
</compile_context>

<pallas_src>
import jax
import jax.numpy as jnp
from jax import lax
from jax.experimental import pallas as pl
from jax.experimental.pallas import tpu as pltpu

HIDDEN = 128   # fc1 output size (nn.Linear(input_size, 128))
OUT = 1        # fc2 output size (nn.Linear(128, 1))


def _cdiv(a, b):
    return -(-a // b)


def _round_up(a, m):
    return _cdiv(a, m) * m


def _vmem_capacity_bytes():
    """Physical VMEM per TensorCore; conservative fallback if unqueryable."""
    try:
        info = pltpu.get_tpu_info()
        cap = getattr(info, "vmem_capacity_bytes", None)
        if cap:
            return int(cap)
    except Exception:
        pass
    return 64 * 1024 * 1024  # v7x-sized (smallest of v5e/v6e/v7x): always safe


def _vmem_plan(D):
    """Pick (vmem_limit_bytes, max tile_b) from the chip's VMEM capacity."""
    cap = _vmem_capacity_bytes()
    # Scoped limit: 75% of physical, never above 100 MiB (v5e/v6e have 128 MiB physical,
    # v7x has 64 MiB -> limit 48 MiB there).
    vmem_limit = min(int(cap * 0.75), 100 * 1024 * 1024)

    lane_d = _round_up(max(D, 1), 128)           # x lanes are padded to 128 in VMEM
    # Conservative f32 bytes per batch row resident in VMEM:
    #   x double-buffer (lane-padded) + hidden temps (h, relu, product) + (tile_b, 1)
    #   output double-buffer (each 8-row group occupies one lane-padded vreg).
    bytes_per_row = 4 * (2 * lane_d + 3 * HIDDEN + 2 * 128)
    tile_cap = int((vmem_limit * 0.65) // bytes_per_row)
    tile_cap = max(512, min(tile_cap, 16384))
    tile_cap -= tile_cap % 8                      # sublane multiple
    return vmem_limit, tile_cap


def simplenet_kernel(x_ref, w1t_ref, b1_ref, w2_ref, b2_ref, o_ref):
    # x_ref:   (TILE_B, D)   activation tile (streamed / double-buffered)
    # w1t_ref: (D, HIDDEN)   fc1 weight, pre-transposed once in the wrapper; VMEM-resident
    # b1_ref:  (1, HIDDEN)   fc1 bias row
    # w2_ref:  (1, HIDDEN)   fc2 weight row
    # b2_ref:  (1, 1)        fc2 bias scalar in SMEM
    # o_ref:   (TILE_B, 1)   output column (partial last block is masked by Pallas)

    # fc1 on the MXU in native (M,K)x(K,N) form, f32 accumulate: h[b, j] = sum_d x[b, d] * W1T[d, j]
    h = lax.dot_general(
        x_ref[...], w1t_ref[...],
        dimension_numbers=(((1,), (0,)), ((), ())),
        preferred_element_type=jnp.float32,
    )
    h = jnp.maximum(h + b1_ref[...], 0.0)                       # bias + ReLU (VPU, f32)

    # fc2: VPU multiply + XLU lane reduction (keeps the MXU free of an N=1 matmul)
    z = jnp.sum(h * w2_ref[...], axis=1, keepdims=True) + b2_ref[0, 0]   # (TILE_B, 1)

    # Exact sigmoid: EUP exp + exact reciprocal.
    o_ref[...] = pl.reciprocal(1.0 + jnp.exp(-z), approx=False).astype(o_ref.dtype)


def simplenet_forward(x, w1, b1, w2, b2, *, tile_b=None):
    """Forward pass of SimpleNet.

    x: (B, D). Params in PyTorch nn.Linear layout: w1 (128, D), b1 (128,), w2 (1, 128), b2 (1,).
    Returns (B, 1) float32, same semantics as the torch module's forward().
    """
    B, D = x.shape
    assert w1.shape == (HIDDEN, D)

    # One-time, tiny weight prep (128*D elements); x itself is NOT copied or cast.
    w1t = jnp.asarray(w1).T.astype(x.dtype)                     # (D, HIDDEN)
    b1_row = jnp.asarray(b1, jnp.float32).reshape(1, HIDDEN)
    w2_row = jnp.asarray(w2, jnp.float32).reshape(1, HIDDEN)
    b2_s = jnp.asarray(b2, jnp.float32).reshape(1, 1)

    vmem_limit, tile_cap = _vmem_plan(D)
    if tile_b is None:
        tile_b = tile_cap
    tile_b = int(tile_b)

    if B <= tile_b:
        if B >= 1024:
            # Split into two (near-)even steps so a 2-TC chip (v7x) gets both cores busy.
            tile_b = _round_up(_cdiv(B, 2), 8)
            grid_n = _cdiv(B, tile_b)
        else:
            tile_b = B           # single full-batch block (block == full array dim is legal)
            grid_n = 1
    else:
        tile_b = max(8, tile_b - tile_b % 8)
        grid_n = _cdiv(B, tile_b)   # ragged last block; Pallas masks the partial output store

    out = pl.pallas_call(
        simplenet_kernel,
        out_shape=jax.ShapeDtypeStruct((B, OUT), jnp.float32),
        grid_spec=pltpu.PrefetchScalarGridSpec(
            num_scalar_prefetch=0,
            grid=(grid_n,),
            in_specs=[
                pl.BlockSpec((tile_b, D), lambda i: (i, 0)),          # x tile, streamed
                pl.BlockSpec((D, HIDDEN), lambda i: (0, 0)),          # W1^T, VMEM-resident
                pl.BlockSpec((1, HIDDEN), lambda i: (0, 0)),          # b1 row
                pl.BlockSpec((1, HIDDEN), lambda i: (0, 0)),          # w2 row
                pl.BlockSpec(memory_space=pltpu.MemorySpace.SMEM),    # b2 scalar
            ],
            out_specs=pl.BlockSpec((tile_b, OUT), lambda i: (i, 0)),
        ),
        compiler_params=pltpu.CompilerParams(
            dimension_semantics=("parallel",),
            vmem_limit_bytes=vmem_limit,
        ),
    )(x, w1t, b1_row, w2_row, b2_s)

    return out


def init_params(key, input_size):
    # PyTorch nn.Linear default init (uniform +/- 1/sqrt(fan_in)), PyTorch layouts.
    k1, k2, k3, k4 = jax.random.split(key, 4)
    bound1 = 1.0 / jnp.sqrt(jnp.float32(input_size))
    bound2 = 1.0 / jnp.sqrt(jnp.float32(HIDDEN))
    w1 = jax.random.uniform(k1, (HIDDEN, input_size), jnp.float32, -bound1, bound1)
    b1 = jax.random.uniform(k2, (HIDDEN,), jnp.float32, -bound1, bound1)
    w2 = jax.random.uniform(k3, (OUT, HIDDEN), jnp.float32, -bound2, bound2)
    b2 = jax.random.uniform(k4, (OUT,), jnp.float32, -bound2, bound2)
    return w1, b1, w2, b2


def reference_forward(x, w1, b1, w2, b2):
    h = jnp.maximum(x @ w1.T + b1, 0.0)
    return jax.nn.sigmoid(h @ w2.T + b2)


if __name__ == "__main__":
    key = jax.random.PRNGKey(0)
    k_x, k_p, k_x2 = jax.random.split(key, 3)

    input_size = 32
    w1, b1, w2, b2 = init_params(k_p, input_size)

    # Small batch: single grid step, full-array blocks.
    x_small = jax.random.normal(k_x, (8, input_size), jnp.float32)
    out = jax.block_until_ready(simplenet_forward(x_small, w1, b1, w2, b2))
    ref = reference_forward(x_small, w1, b1, w2, b2)
    assert out.shape == (8, OUT)
    assert jnp.allclose(out, ref, atol=1e-3, rtol=1e-3)

    # Larger, non-multiple batch with an explicit small tile: exercises the ragged
    # last block (no wrapper-side padding) and the multi-step streaming pipeline.
    x_big = jax.random.normal(k_x2, (2000, input_size), jnp.float32)
    out_big = jax.block_until_ready(simplenet_forward(x_big, w1, b1, w2, b2, tile_b=512))
    ref_big = reference_forward(x_big, w1, b1, w2, b2)
    assert out_big.shape == (2000, OUT)
    assert jnp.allclose(out_big, ref_big, atol=1e-3, rtol=1e-3)

    # Same batch through the default VMEM-budget tile path (2-step split for v7x cores).
    out_big2 = jax.block_until_ready(simplenet_forward(x_big, w1, b1, w2, b2))
    assert jnp.allclose(out_big2, ref_big, atol=1e-3, rtol=1e-3)

    print("KERNEL_OK")
</pallas_src>

<mosaic_0001>
module attributes {stable_mosaic.version = 11 : i64} {
  func.func @simplenet_kernel(%arg0: i32, %arg1: memref<8x32xf32, #tpu.memory_space<vmem>>, %arg2: memref<32x128xf32, #tpu.memory_space<vmem>>, %arg3: memref<1x128xf32, #tpu.memory_space<vmem>>, %arg4: memref<1x128xf32, #tpu.memory_space<vmem>>, %arg5: memref<1x1xf32, #tpu.memory_space<smem>>, %arg6: memref<8x1xf32, #tpu.memory_space<vmem>>) attributes {dimension_semantics = [#tpu.dimension_semantics<parallel>], iteration_bounds = array<i64: 1>, scalar_prefetch = 0 : i64, scratch_operands = 0 : i64, tpu.core_type = #tpu.core_type<tc>, window_params = [{transform_indices = @transform_0, window_bounds = array<i64: 8, 32>}, {pipeline_mode = #tpu.pipeline_mode<synchronous>, transform_indices = @transform_1, window_bounds = array<i64: 32, 128>}, {pipeline_mode = #tpu.pipeline_mode<synchronous>, transform_indices = @transform_2, window_bounds = array<i64: 1, 128>}, {pipeline_mode = #tpu.pipeline_mode<synchronous>, transform_indices = @transform_3, window_bounds = array<i64: 1, 128>}, {transform_indices = @transform_4, window_bounds = array<i64: 1, 1>}, {transform_indices = @transform_5, window_bounds = array<i64: 8, 1>}]} {
    %c0 = arith.constant 0 : index
    %c0_0 = arith.constant 0 : index
    %0 = vector.load %arg1[%c0, %c0_0] : memref<8x32xf32, #tpu.memory_space<vmem>>, vector<8x32xf32>
    %c0_1 = arith.constant 0 : index
    %c0_2 = arith.constant 0 : index
    %1 = vector.load %arg2[%c0_1, %c0_2] : memref<32x128xf32, #tpu.memory_space<vmem>>, vector<32x128xf32>
    %cst = arith.constant dense<0.000000e+00> : vector<8x128xf32>
    %2 = tpu.matmul %0, %1, %cst {dimension_numbers = #tpu.dot_dimension_numbers<[1], [0], [0], [1], [0, 0, 1, 1], [], []>} : vector<8x32xf32>, vector<32x128xf32>, vector<8x128xf32> -> vector<8x128xf32>
    %c0_3 = arith.constant 0 : index
    %c0_4 = arith.constant 0 : index
    %3 = vector.load %arg3[%c0_3, %c0_4] : memref<1x128xf32, #tpu.memory_space<vmem>>, vector<1x128xf32>
    %4 = vector.broadcast %3 : vector<1x128xf32> to vector<8x128xf32>
    %5 = arith.addf %2, %4 : vector<8x128xf32>
    %cst_5 = arith.constant 0.000000e+00 : f32
    %6 = vector.broadcast %cst_5 : f32 to vector<8x128xf32>
    %7 = arith.maximumf %5, %6 : vector<8x128xf32>
    %c0_6 = arith.constant 0 : index
    %c0_7 = arith.constant 0 : index
    %8 = vector.load %arg4[%c0_6, %c0_7] : memref<1x128xf32, #tpu.memory_space<vmem>>, vector<1x128xf32>
    %9 = vector.broadcast %8 : vector<1x128xf32> to vector<8x128xf32>
    %10 = arith.mulf %7, %9 : vector<8x128xf32>
    %cst_8 = arith.constant dense<0.000000e+00> : vector<8xf32>
    %11 = vector.multi_reduction <add>, %10, %cst_8 [1] : vector<8x128xf32> to vector<8xf32>
    %12 = vector.shape_cast %11 : vector<8xf32> to vector<8x1xf32>
    %c0_9 = arith.constant 0 : index
    %c0_10 = arith.constant 0 : index
    %13 = memref.load %arg5[%c0_9, %c0_10] : memref<1x1xf32, #tpu.memory_space<smem>>
    %14 = vector.broadcast %13 : f32 to vector<8x1xf32>
    %15 = arith.addf %12, %14 : vector<8x1xf32>
    %cst_11 = arith.constant 0.000000e+00 : f32
    %16 = vector.broadcast %cst_11 : f32 to vector<8x1xf32>
    %17 = arith.subf %16, %15 : vector<8x1xf32>
    %18 = math.exp %17 : vector<8x1xf32>
    %cst_12 = arith.constant 1.000000e+00 : f32
    %19 = vector.broadcast %cst_12 : f32 to vector<8x1xf32>
    %20 = arith.addf %19, %18 : vector<8x1xf32>
    %21 = tpu.reciprocal %20 : vector<8x1xf32> -> vector<8x1xf32>
    %c0_13 = arith.constant 0 : index
    %c0_14 = arith.constant 0 : index
    %22 = vector.load %arg6[%c0_13, %c0_14] : memref<8x1xf32, #tpu.memory_space<vmem>>, vector<8x1xf32>
    tpu.vector_store %arg6[%c0_13, %c0_14], %21 {strides = array<i32>} : memref<8x1xf32, #tpu.memory_space<vmem>>, vector<8x1xf32>,
    return
  }
  func.func @transform_0(%arg0: i32) -> (i32, i32) {
    %c0_i32 = arith.constant 0 : i32
    %c0_i32_0 = arith.constant 0 : i32
    return %arg0, %c0_i32 : i32, i32
  }
  func.func @transform_1(%arg0: i32) -> (i32, i32) {
    %c0_i32 = arith.constant 0 : i32
    %c0_i32_0 = arith.constant 0 : i32
    %c0_i32_1 = arith.constant 0 : i32
    return %c0_i32, %c0_i32_0 : i32, i32
  }
  func.func @transform_2(%arg0: i32) -> (i32, i32) {
    %c0_i32 = arith.constant 0 : i32
    %c0_i32_0 = arith.constant 0 : i32
    %c0_i32_1 = arith.constant 0 : i32
    return %c0_i32, %c0_i32_0 : i32, i32
  }
  func.func @transform_3(%arg0: i32) -> (i32, i32) {
    %c0_i32 = arith.constant 0 : i32
    %c0_i32_0 = arith.constant 0 : i32
    %c0_i32_1 = arith.constant 0 : i32
    return %c0_i32, %c0_i32_0 : i32, i32
  }
  func.func @transform_4(%arg0: i32) -> (i32, i32) {
    %c0_i32 = arith.constant 0 : i32
    %c0_i32_0 = arith.constant 0 : i32
    %c0_i32_1 = arith.constant 0 : i32
    return %c0_i32, %c0_i32_0 : i32, i32
  }
  func.func @transform_5(%arg0: i32) -> (i32, i32) {
    %c0_i32 = arith.constant 0 : i32
    %c0_i32_0 = arith.constant 0 : i32
    return %arg0, %c0_i32 : i32, i32
  }
}

</mosaic_0001>

<bundles_post_ra>
// kernel: tpu_custom_call.1
= control target key start
LH: loop header
LB: loop body
LE: loop exit
PB: predicated region body
PF: predicated region fallthrough
CT: control target
= control target key end

     0   :  { %11 = vsyncpa [#allocation4], 0  ;;  %s236_s0 = inlined_call_operand.hbm [shape: f32[8,32], index: 0, kind: input, shape index: {}]   ;;  %s237_s1 = inlined_call_operand.hbm [shape: f32[32,128], index: 1, kind: input, shape index: {}]   ;;  %s238_s2 = inlined_call_operand.vmem [shape: f32[1,128], index: 2, kind: input, shape index: {}]   ;;  %s239_s3 = inlined_call_operand.vmem [shape: f32[1,128], index: 3, kind: input, shape index: {}]   ;;  %s240_s4 = inlined_call_operand.<no memory space> [shape: f32[1,1], index: 4, kind: input, shape index: {}]   ;;  %s241_s5 = inlined_call_operand.vmem [shape: f32[8,1], index: 5, kind: output, shape index: {}]  }
   0x1   :  { %s18_s20 = sshll.u32 %s236_s0, 4  ;;  %s19_s20 = int_to_ptr.hbm [resolvable:$true] %s18_s20 }
   0x2   :  { %12 = vsyncpa [#allocation6], 0  ;;  %s184_s21 = smov [#allocation3]   ;;  %s28_s25 = sshll.u32 %s237_s1, 4  ;;  %s29_s25 = int_to_ptr.hbm [resolvable:$true] %s28_s25 }
   0x3   :  { %s20_s22 = sshll.u32 %s184_s21, 4  ;;  %s185_s26 = smov [#allocation5]   ;;  %s21_s22 = int_to_ptr.vmem [resolvable:$true] %s20_s22 }
   0x4   :  { %23 = dma.hbm_to_vmem [thread:$0]  %s19_s20, 128, %s21_s22, [#allocation4]  }
   0x5   :  { %s30_s27 = sshll.u32 %s185_s26, 4  ;;  %s186_s28 = smov 128   ;;  %s31_s27 = int_to_ptr.vmem [resolvable:$true] %s30_s27 }
   0x6   :  { %s187_s29 = smov 8  }
   0x7   :  { %36 = dma.hbm_to_vmem [thread:$0]  %s29_s25, 512, %s31_s27, [#allocation6], %s186_s28, %s186_s28, %s187_s29  }
   0x8   :  { %180 = dma.done.wait [#allocation4], 128  }
   0x9   :  { %181 = vsyncadd [#allocation4], 4294967168 }
   0xa   :  { %182 = dma.done.wait [#allocation6], 512  }
   0xb   :  { %183 = vsyncadd [#allocation6], 4294966784  ;;  %v55_v0 = vld [vmem:[#allocation5 + $0x18] sm:$0xff]  ;;  %v54_v1 = vld [vmem:[#allocation5 + $0x10] sm:$0xff]  ;;  %vm60_vm0 = vcmask 261120   ;;  %v93_v11 = vstv %s240_s4  ;;  %vm113_vm4 = vcmask 7168  }
   0xc   :  { %76 = vmatpush.msra.mxu0 %v55_v0  ;;  %v53_v2 = vld [vmem:[#allocation5 + $0x8] sm:$0xff]  ;;  %v52_v3 = vld [vmem:[#allocation5] sm:$0xff]  ;;  %v51_v4 = vld [vmem:[#allocation3] sm:$0xff] }
   0xd   :  { %v126_v5 = vld [vmem:[%s238_s2] ss:$0 sm:$0xff] }
   0xe   :  { %77 = vmatpush.msra.mxu0 %v54_v1  ;;  %v127_v8 = vld [vmem:[%s239_s3] ss:$0 sm:$0xff] }
  0x10   :  { %78 = vmatpush.msra.mxu0 %v53_v2 }
  0x12   :  { %79 = vmatpush.msra.mxu0 %v52_v3 }
  0x13   :  { %121 = vmatmul.msk.f32.vlgmr.msra.gmra.mxu0 %vm60_vm0, %v51_v4 }
  0x90   :  { %v81_v6 = vpop.f32.mrf.mxu0 }
  0x91   :  { %v82_v7 = vadd.f32 %v126_v5, %v81_v6 }
  0x93   :  { %v84_v9 = vmax.f32 %v82_v7, 0.0 }
  0x95   :  { %v89_v10 = vmul.f32 %v127_v8, %v84_v9 }
  0x97   :  { %90 = vadd.xlane.f32.xlu0 %v89_v10 }
 0x10a   :  { %v91_v12 = vpop.xlane.xlu0 %90 }
 0x10b   :  { %v94_v13 = vadd.f32 %v93_v11, %v91_v12 }
 0x10d   :  { %v95_v14 = vsub.f32 0.0, %v94_v13 }
 0x10f   :  { %v96_v15 = vmul.f32 1.442695, %v95_v14 }
 0x111   :  { %128 = vpow2.f32 %v96_v15 }
 0x117   :  { %v129_v16 = vpop.eup %128 }
 0x118   :  { %v98_v17 = vadd.f32 1.0, %v129_v16 }
 0x11a   :  { %130 = vrcp.f32 %v98_v17  ;;  %v110_v21 = vand.u32 2147483648, %v98_v17  ;;  %v108_v23 = vand.u32 2147483647, %v98_v17  ;;  %vm104_vm2 = vweird.f32 %v98_v17 }
 0x11c   :  { %v111_v25 = vor.u32 1.1754944e-38, %v110_v21  ;;  %vm109_vm5 = vcmp.eq.f32.partialorder %v108_v23, 8.507059e+37 }
 0x120   :  { %v131_v18 = vpop.eup %130 }
 0x121   :  { %v100_v19 = vmul.f32 %v131_v18, %v98_v17  ;;  %vm105_vm1 = vweird.f32 %v131_v18 }
 0x122   :  { %vm106_vm3 = vmor %vm104_vm2, %vm105_vm1 }
 0x123   :  { %v101_v20 = vsub.f32 1.0, %v100_v19 }
 0x125   :  { %v102_v22 = vmul.f32 %v131_v18, %v101_v20 }
 0x127   :  { %v103_v24 = vadd.f32 %v131_v18, %v102_v22 }
 0x129   :  { %v107_v26 = vsel %vm106_vm3, %v131_v18, %v103_v24 }
 0x12a   :  { %v112_v27 = vsel %vm109_vm5, %v111_v25, %v107_v26 }
 0x12b   :  { %114 = vst.msk [vmem:[%s241_s5] sm:$0xff] %vm113_vm4, %v112_v27 }
 0x12c   :  { %119 = vsyncpa [#allocation4], 1 }
 0x12d   :  { %120 = vsyncpa [#allocation6], 1 }

</bundles_post_ra>
